<compile_context>
chip_gen: v5e
topology: v5e:2x2
jax: 0.10.0
libtpu: 0.0.40
codegen_flags: <defaults>
</compile_context>

<pallas_src>
import functools

import jax
import jax.numpy as jnp
from jax.experimental import pallas as pl
from jax.experimental.pallas import tpu as pltpu


def _round_up(x, m):
    return (x + m - 1) // m * m


# ------------------------------- kernel --------------------------------------
def _fc_decoder_kernel(x_ref, w1_ref, b1_ref, w2_ref, b2_ref, w3_ref, b3_ref,
                       o_ref):
    """One batch tile of relu(relu(x@W1+b1)@W2+b2)@W3+b3, fully fused in VMEM."""
    dot = lambda a, b: jnp.dot(a, b, preferred_element_type=jnp.float32)

    x = x_ref[...]
    h = jnp.maximum(dot(x, w1_ref[...]) + b1_ref[...], 0.0)   # [bm, p*8]
    h = jnp.maximum(dot(h, w2_ref[...]) + b2_ref[...], 0.0)   # [bm, p*16]
    o_ref[...] = (dot(h, w3_ref[...]) + b3_ref[...]).astype(o_ref.dtype)


# --------------------------- host-side packing --------------------------------
def _pack_params(w_in_out, b, p):
    """w:[in,out] -> kron(I_p, w):[p*in, p*out];  b:[out] -> [1, p*out]."""
    w_p = jnp.kron(jnp.eye(p, dtype=w_in_out.dtype), w_in_out)
    b_p = jnp.tile(b.reshape(1, -1), (1, p))
    return w_p, b_p


# ------------------------------- wrapper --------------------------------------
@functools.partial(jax.jit, static_argnames=("pack", "block_m"))
def fc_decoder_forward(x, w1, b1, w2, b2, w3, b3, *, pack=4, block_m=1024):
    """Fused FCDecoder forward. Weights in nn.Linear layout: wk is [out, in]."""
    x = jnp.asarray(x, jnp.float32)
    lead_shape = x.shape[:-1]
    d_in = x.shape[-1]
    x2 = x.reshape(-1, d_in)
    B = x2.shape[0]

    # nn.Linear stores [out, in]; matmul wants [in, out].
    w1t = jnp.asarray(w1, jnp.float32).T
    w2t = jnp.asarray(w2, jnp.float32).T
    w3t = jnp.asarray(w3, jnp.float32).T
    b1 = jnp.asarray(b1, jnp.float32)
    b2 = jnp.asarray(b2, jnp.float32)
    b3 = jnp.asarray(b3, jnp.float32)

    d1, d2, d_out = w1t.shape[1], w2t.shape[1], w3t.shape[1]
    assert w1t.shape[0] == d_in and w2t.shape[0] == d1 and w3t.shape[0] == d2

    # --- lane-dense batch packing ---------------------------------------------
    p = max(1, int(pack))
    B_pack = _round_up(max(B, 1), p)          # pad at most p-1 rows (tiny)
    if B_pack != B:
        x2 = jnp.pad(x2, ((0, B_pack - B), (0, 0)))
    Bp = B_pack // p

    xp = x2.reshape(Bp, p * d_in)             # free row-major reshape
    w1p, b1p = _pack_params(w1t, b1, p)
    w2p, b2p = _pack_params(w2t, b2, p)
    w3p, b3p = _pack_params(w3t, b3, p)
    din_p, d1_p, d2_p, dout_p = p * d_in, p * d1, p * d2, p * d_out

    # --- batch tiling ----------------------------------------------------------
    # Big tiles to amortize per-step overhead; keep >=2 grid steps when the
    # batch allows it (v7x megacore), never pad the batch up to the tile size.
    bm = max(8, min(_round_up(block_m, 8), _round_up(pl.cdiv(Bp, 2), 8)))
    grid = (pl.cdiv(Bp, bm),)

    pinned = lambda shape: pl.BlockSpec(shape, lambda i: (0, 0))  # VMEM-resident
    in_specs = [
        pl.BlockSpec((bm, din_p), lambda i: (i, 0)),   # x tile, streamed over batch
        pinned((din_p, d1_p)), pinned((1, d1_p)),      # W1, b1 (block-diagonal)
        pinned((d1_p, d2_p)), pinned((1, d2_p)),       # W2, b2
        pinned((d2_p, dout_p)), pinned((1, dout_p)),   # W3, b3
    ]
    out_spec = pl.BlockSpec((bm, dout_p), lambda i: (i, 0))

    # Advisory cost + scoped-VMEM budget (tiles double-buffered, intermediates,
    # params with margin); capped under the v7x scoped limit.
    flops = 2 * Bp * (din_p * d1_p + d1_p * d2_p + d2_p * dout_p)
    param_bytes = 4 * (din_p * d1_p + d1_p + d1_p * d2_p + d2_p
                       + d2_p * dout_p + dout_p)
    bytes_accessed = 4 * Bp * (din_p + dout_p) + param_bytes
    vmem_bytes = 4 * bm * (2 * (din_p + dout_p) + d1_p + d2_p) + 2 * param_bytes
    vmem_limit = int(min(max(4 * vmem_bytes, 8 << 20), 28 << 20))

    out = pl.pallas_call(
        _fc_decoder_kernel,
        out_shape=jax.ShapeDtypeStruct((Bp, dout_p), jnp.float32),
        grid_spec=pltpu.PrefetchScalarGridSpec(
            num_scalar_prefetch=0,
            grid=grid,
            in_specs=in_specs,
            out_specs=out_spec,
        ),
        compiler_params=pltpu.CompilerParams(
            dimension_semantics=("parallel",),
            vmem_limit_bytes=vmem_limit,
        ),
        cost_estimate=pl.CostEstimate(
            flops=flops, transcendentals=0, bytes_accessed=bytes_accessed),
    )(xp, w1p, b1p, w2p, b2p, w3p, b3p)

    out = out.reshape(B_pack, d_out)          # free un-packing reshape
    if B_pack != B:
        out = out[:B]
    return out.reshape(lead_shape + (d_out,))


# --------------------------- pure-JAX reference --------------------------------
def fc_decoder_ref(x, w1, b1, w2, b2, w3, b3):
    h = jax.nn.relu(x @ w1.T + b1)
    h = jax.nn.relu(h @ w2.T + b2)
    return h @ w3.T + b3


# --------------------------------- demo ----------------------------------------
if __name__ == "__main__":
    key = jax.random.PRNGKey(0)
    B, bottleneck = 2, 4
    ks = jax.random.split(key, 8)

    x = jax.random.normal(ks[0], (B, bottleneck), jnp.float32)
    # nn.Linear layout: weight is [out_features, in_features].
    w1 = 0.5 * jax.random.normal(ks[1], (8, bottleneck), jnp.float32)
    b1 = 0.1 * jax.random.normal(ks[2], (8,), jnp.float32)
    w2 = 0.5 * jax.random.normal(ks[3], (16, 8), jnp.float32)
    b2 = 0.1 * jax.random.normal(ks[4], (16,), jnp.float32)
    w3 = 0.5 * jax.random.normal(ks[5], (32, 16), jnp.float32)
    b3 = 0.1 * jax.random.normal(ks[6], (32,), jnp.float32)

    # Small-batch check (matches the module's default usage).
    out = fc_decoder_forward(x, w1, b1, w2, b2, w3, b3)
    out = jax.block_until_ready(out)
    ref = fc_decoder_ref(x, w1, b1, w2, b2, w3, b3)
    assert out.shape == (B, 32) and out.dtype == jnp.float32
    assert bool(jnp.all(jnp.isfinite(out)))
    assert bool(jnp.allclose(out, ref, rtol=1e-4, atol=1e-4))

    # Ragged-batch check (exercises packing pad + partial last grid tile).
    Bl = 997
    xl = jax.random.normal(ks[7], (Bl, bottleneck), jnp.float32)
    outl = jax.block_until_ready(
        fc_decoder_forward(xl, w1, b1, w2, b2, w3, b3, block_m=128))
    refl = fc_decoder_ref(xl, w1, b1, w2, b2, w3, b3)
    assert outl.shape == (Bl, 32)
    assert bool(jnp.allclose(outl, refl, rtol=1e-4, atol=1e-4))

    print("KERNEL_OK")
</pallas_src>

<mosaic_0001>
module attributes {stable_mosaic.version = 11 : i64} {
  func.func @_fc_decoder_kernel(%arg0: i32, %arg1: memref<8x16xf32, #tpu.memory_space<vmem>>, %arg2: memref<16x32xf32, #tpu.memory_space<vmem>>, %arg3: memref<1x32xf32, #tpu.memory_space<vmem>>, %arg4: memref<32x64xf32, #tpu.memory_space<vmem>>, %arg5: memref<1x64xf32, #tpu.memory_space<vmem>>, %arg6: memref<64x128xf32, #tpu.memory_space<vmem>>, %arg7: memref<1x128xf32, #tpu.memory_space<vmem>>, %arg8: memref<8x128xf32, #tpu.memory_space<vmem>>) attributes {dimension_semantics = [#tpu.dimension_semantics<parallel>], iteration_bounds = array<i64: 1>, scalar_prefetch = 0 : i64, scratch_operands = 0 : i64, tpu.core_type = #tpu.core_type<tc>, window_params = [{transform_indices = @transform_0, window_bounds = array<i64: 8, 16>}, {pipeline_mode = #tpu.pipeline_mode<synchronous>, transform_indices = @transform_1, window_bounds = array<i64: 16, 32>}, {pipeline_mode = #tpu.pipeline_mode<synchronous>, transform_indices = @transform_2, window_bounds = array<i64: 1, 32>}, {pipeline_mode = #tpu.pipeline_mode<synchronous>, transform_indices = @transform_3, window_bounds = array<i64: 32, 64>}, {pipeline_mode = #tpu.pipeline_mode<synchronous>, transform_indices = @transform_4, window_bounds = array<i64: 1, 64>}, {pipeline_mode = #tpu.pipeline_mode<synchronous>, transform_indices = @transform_5, window_bounds = array<i64: 64, 128>}, {pipeline_mode = #tpu.pipeline_mode<synchronous>, transform_indices = @transform_6, window_bounds = array<i64: 1, 128>}, {transform_indices = @transform_7, window_bounds = array<i64: 8, 128>}]} {
    %c0 = arith.constant 0 : index
    %c0_0 = arith.constant 0 : index
    %0 = vector.load %arg1[%c0, %c0_0] : memref<8x16xf32, #tpu.memory_space<vmem>>, vector<8x16xf32>
    %c0_1 = arith.constant 0 : index
    %c0_2 = arith.constant 0 : index
    %1 = vector.load %arg2[%c0_1, %c0_2] : memref<16x32xf32, #tpu.memory_space<vmem>>, vector<16x32xf32>
    %cst = arith.constant dense<0.000000e+00> : vector<8x32xf32>
    %2 = tpu.matmul %0, %1, %cst {dimension_numbers = #tpu.dot_dimension_numbers<[1], [0], [0], [1], [0, 0, 1, 1], [], []>} : vector<8x16xf32>, vector<16x32xf32>, vector<8x32xf32> -> vector<8x32xf32>
    %c0_3 = arith.constant 0 : index
    %c0_4 = arith.constant 0 : index
    %3 = vector.load %arg3[%c0_3, %c0_4] : memref<1x32xf32, #tpu.memory_space<vmem>>, vector<1x32xf32>
    %4 = vector.broadcast %3 : vector<1x32xf32> to vector<8x32xf32>
    %5 = arith.addf %2, %4 : vector<8x32xf32>
    %cst_5 = arith.constant 0.000000e+00 : f32
    %6 = vector.broadcast %cst_5 : f32 to vector<8x32xf32>
    %7 = arith.maximumf %5, %6 : vector<8x32xf32>
    %c0_6 = arith.constant 0 : index
    %c0_7 = arith.constant 0 : index
    %8 = vector.load %arg4[%c0_6, %c0_7] : memref<32x64xf32, #tpu.memory_space<vmem>>, vector<32x64xf32>
    %cst_8 = arith.constant dense<0.000000e+00> : vector<8x64xf32>
    %9 = tpu.matmul %7, %8, %cst_8 {dimension_numbers = #tpu.dot_dimension_numbers<[1], [0], [0], [1], [0, 0, 1, 1], [], []>} : vector<8x32xf32>, vector<32x64xf32>, vector<8x64xf32> -> vector<8x64xf32>
    %c0_9 = arith.constant 0 : index
    %c0_10 = arith.constant 0 : index
    %10 = vector.load %arg5[%c0_9, %c0_10] : memref<1x64xf32, #tpu.memory_space<vmem>>, vector<1x64xf32>
    %11 = vector.broadcast %10 : vector<1x64xf32> to vector<8x64xf32>
    %12 = arith.addf %9, %11 : vector<8x64xf32>
    %cst_11 = arith.constant 0.000000e+00 : f32
    %13 = vector.broadcast %cst_11 : f32 to vector<8x64xf32>
    %14 = arith.maximumf %12, %13 : vector<8x64xf32>
    %c0_12 = arith.constant 0 : index
    %c0_13 = arith.constant 0 : index
    %15 = vector.load %arg6[%c0_12, %c0_13] : memref<64x128xf32, #tpu.memory_space<vmem>>, vector<64x128xf32>
    %cst_14 = arith.constant dense<0.000000e+00> : vector<8x128xf32>
    %16 = tpu.matmul %14, %15, %cst_14 {dimension_numbers = #tpu.dot_dimension_numbers<[1], [0], [0], [1], [0, 0, 1, 1], [], []>} : vector<8x64xf32>, vector<64x128xf32>, vector<8x128xf32> -> vector<8x128xf32>
    %c0_15 = arith.constant 0 : index
    %c0_16 = arith.constant 0 : index
    %17 = vector.load %arg7[%c0_15, %c0_16] : memref<1x128xf32, #tpu.memory_space<vmem>>, vector<1x128xf32>
    %18 = vector.broadcast %17 : vector<1x128xf32> to vector<8x128xf32>
    %19 = arith.addf %16, %18 : vector<8x128xf32>
    %c0_17 = arith.constant 0 : index
    %c0_18 = arith.constant 0 : index
    %20 = vector.load %arg8[%c0_17, %c0_18] : memref<8x128xf32, #tpu.memory_space<vmem>>, vector<8x128xf32>
    tpu.vector_store %arg8[%c0_17, %c0_18], %19 {strides = array<i32>} : memref<8x128xf32, #tpu.memory_space<vmem>>, vector<8x128xf32>,
    return
  }
  func.func @transform_0(%arg0: i32) -> (i32, i32) {
    %c0_i32 = arith.constant 0 : i32
    %c0_i32_0 = arith.constant 0 : i32
    return %arg0, %c0_i32 : i32, i32
  }
  func.func @transform_1(%arg0: i32) -> (i32, i32) {
    %c0_i32 = arith.constant 0 : i32
    %c0_i32_0 = arith.constant 0 : i32
    %c0_i32_1 = arith.constant 0 : i32
    return %c0_i32, %c0_i32_0 : i32, i32
  }
  func.func @transform_2(%arg0: i32) -> (i32, i32) {
    %c0_i32 = arith.constant 0 : i32
    %c0_i32_0 = arith.constant 0 : i32
    %c0_i32_1 = arith.constant 0 : i32
    return %c0_i32, %c0_i32_0 : i32, i32
  }
  func.func @transform_3(%arg0: i32) -> (i32, i32) {
    %c0_i32 = arith.constant 0 : i32
    %c0_i32_0 = arith.constant 0 : i32
    %c0_i32_1 = arith.constant 0 : i32
    return %c0_i32, %c0_i32_0 : i32, i32
  }
  func.func @transform_4(%arg0: i32) -> (i32, i32) {
    %c0_i32 = arith.constant 0 : i32
    %c0_i32_0 = arith.constant 0 : i32
    %c0_i32_1 = arith.constant 0 : i32
    return %c0_i32, %c0_i32_0 : i32, i32
  }
  func.func @transform_5(%arg0: i32) -> (i32, i32) {
    %c0_i32 = arith.constant 0 : i32
    %c0_i32_0 = arith.constant 0 : i32
    %c0_i32_1 = arith.constant 0 : i32
    return %c0_i32, %c0_i32_0 : i32, i32
  }
  func.func @transform_6(%arg0: i32) -> (i32, i32) {
    %c0_i32 = arith.constant 0 : i32
    %c0_i32_0 = arith.constant 0 : i32
    %c0_i32_1 = arith.constant 0 : i32
    return %c0_i32, %c0_i32_0 : i32, i32
  }
  func.func @transform_7(%arg0: i32) -> (i32, i32) {
    %c0_i32 = arith.constant 0 : i32
    %c0_i32_0 = arith.constant 0 : i32
    return %arg0, %c0_i32 : i32, i32
  }
}

</mosaic_0001>

<bundles_post_ra>
// kernel: fc_decoder_forward.1
= control target key start
LH: loop header
LB: loop body
LE: loop exit
PB: predicated region body
PF: predicated region fallthrough
CT: control target
= control target key end

     0   :  { %vm33_vm0 = vcmask 130048   ;;  %vm66_vm1 = vcmask 261120   ;;  %vm103_vm2 = vcmask 523264   ;;  %s272_s0 = inlined_call_operand.vmem [shape: f32[1,16], index: 0, kind: input, shape index: {}]   ;;  %s273_s1 = inlined_call_operand.vmem [shape: f32[16,32], index: 1, kind: input, shape index: {}]   ;;  %s274_s2 = inlined_call_operand.vmem [shape: f32[1,32], index: 2, kind: input, shape index: {}]   ;;  %s275_s3 = inlined_call_operand.vmem [shape: f32[32,64], index: 3, kind: input, shape index: {}]   ;;  %s276_s4 = inlined_call_operand.vmem [shape: f32[1,64], index: 4, kind: input, shape index: {}]   ;;  %s277_s5 = inlined_call_operand.vmem [shape: f32[64,128], index: 5, kind: input, shape index: {}]   ;;  %s278_s6 = inlined_call_operand.vmem [shape: f32[1,128], index: 6, kind: input, shape index: {}]   ;;  %s279_s7 = inlined_call_operand.vmem [shape: f32[1,128], index: 7, kind: output, shape index: {}]  }
   0x1   :  { %v28_v0 = vld [vmem:[%s273_s1 + $0x8] sm:$0xff]  ;;  %v27_v1 = vld [vmem:[%s273_s1] sm:$0xff]  ;;  %v61_v3 = vld [vmem:[%s275_s3 + $0x18] sm:$0xff] }
   0x2   :  { %51 = vmatpush.msra.mxu0 %v28_v0  ;;  %v26_v2 = vld [vmem:[%s272_s0] sm:$0xff]  ;;  %82 = vmatpush.msra.mxu1 %v61_v3  ;;  %v60_v4 = vld [vmem:[%s275_s3 + $0x10] sm:$0xff]  ;;  %v59_v5 = vld [vmem:[%s275_s3 + $0x8] sm:$0xff] }
   0x3   :  { %v58_v6 = vld [vmem:[%s275_s3] sm:$0xff]  ;;  %v98_v7 = vld [vmem:[%s277_s5 + $0x38] sm:$0xff]  ;;  %v97_v8 = vld [vmem:[%s277_s5 + $0x30] sm:$0xff] }
   0x4   :  { %52 = vmatpush.msra.mxu0 %v27_v1  ;;  %83 = vmatpush.msra.mxu1 %v60_v4  ;;  %v96_v9 = vld [vmem:[%s277_s5 + $0x28] sm:$0xff]  ;;  %v95_v10 = vld [vmem:[%s277_s5 + $0x20] sm:$0xff]  ;;  %v94_v11 = vld [vmem:[%s277_s5 + $0x18] sm:$0xff] }
   0x5   :  { %169 = vmatmul.msk.f32.vlgmr.msra.gmra.mxu0 %vm33_vm0, %v26_v2  ;;  %115 = vmatpush.msra.mxu2 %v98_v7  ;;  %v172_v12 = vld [vmem:[%s274_s2] ss:$0 sm:$0xff]  ;;  %v93_v16 = vld [vmem:[%s277_s5 + $0x10] sm:$0xff]  ;;  %v92_v17 = vld [vmem:[%s277_s5 + $0x8] sm:$0xff] }
   0x6   :  { %84 = vmatpush.msra.mxu1 %v59_v5  ;;  %v91_v18 = vld [vmem:[%s277_s5] sm:$0xff] }
   0x7   :  { %116 = vmatpush.msra.mxu2 %v97_v8  ;;  %v173_v19 = vld [vmem:[%s276_s4] ss:$0 sm:$0xff] }
   0x8   :  { %85 = vmatpush.msra.mxu1 %v58_v6  ;;  %v174_v23 = vld [vmem:[%s278_s6] ss:$0 sm:$0xff] }
   0x9   :  { %117 = vmatpush.msra.mxu2 %v96_v9 }
   0xb   :  { %118 = vmatpush.msra.mxu2 %v95_v10 }
   0xd   :  { %119 = vmatpush.msra.mxu2 %v94_v11 }
   0xf   :  { %120 = vmatpush.msra.mxu2 %v93_v16 }
  0x11   :  { %121 = vmatpush.msra.mxu2 %v92_v17 }
  0x13   :  { %122 = vmatpush.msra.mxu2 %v91_v18 }
  0x82   :  { %v54_v13 = vpop.f32.mrf.mxu0 }
  0x83   :  { %v55_v14 = vadd.f32 %v172_v12, %v54_v13 }
  0x85   :  { %v57_v15 = vmax.f32 %v55_v14, 0.0 }
  0x87   :  { %170 = vmatmul.msk.f32.vlgmr.msra.gmra.mxu1 %vm66_vm1, %v57_v15 }
 0x104   :  { %v87_v20 = vpop.f32.mrf.mxu1 }
 0x105   :  { %v88_v21 = vadd.f32 %v173_v19, %v87_v20 }
 0x107   :  { %v90_v22 = vmax.f32 %v88_v21, 0.0 }
 0x109   :  { %171 = vmatmul.msk.f32.vlgmr.msra.gmra.mxu2 %vm103_vm2, %v90_v22 }
 0x18c   :  { %v124_v24 = vpop.f32.mrf.mxu2 }
 0x18d   :  { %v125_v25 = vadd.f32 %v174_v23, %v124_v24 }
 0x18f   :  { %127 = vst [vmem:[#allocation2] sm:$0xff] %v125_v25 }
 0x196   :  { %v146_v26 = vld [vmem:[#allocation2] sm:$0x1] }
 0x197   :  { %147 = vst [vmem:[%s279_s7] sm:$0x1] %v146_v26 }

</bundles_post_ra>
